<compile_context>
chip_gen: v7x
topology: tpu7x:2x2x1
jax: 0.10.0
libtpu: 0.0.40
codegen_flags: <defaults>
</compile_context>

<pallas_src>
import functools

import numpy as np
import jax
import jax.numpy as jnp
from jax.experimental import pallas as pl
from jax.experimental.pallas import tpu as pltpu


# --------------------------------------------------------------------------- #
# Host-side cache / table construction (numpy f32, matches the PyTorch module) #
# --------------------------------------------------------------------------- #

def rope_cache(seq_len, d, base=10000):
    """Reproduces the PyTorch cache build exactly, including its operator
    precedence: theta = 1 / ((base ** i) / d), NOT base ** (i / d), computed in
    float32 (so base**i overflows to inf -> theta==0 for large i, as PyTorch)."""
    i = np.arange(0, d, 2, dtype=np.float32)
    with np.errstate(over="ignore"):
        theta = np.float32(1.0) / (np.float32(base) ** i / np.float32(d))   # [d/2]
    seq_idx = np.arange(seq_len, dtype=np.float32)                          # [S]
    idx_theta = np.einsum("n,d->nd", seq_idx, theta).astype(np.float32)     # [S, d/2]
    idx_theta2 = np.concatenate([idx_theta, idx_theta], axis=1)             # [S, d]
    return np.cos(idx_theta2), np.sin(idx_theta2)


def _build_tables_general(S, d, D, k, base):
    """cos_full: cos over rotated features, 1 over pass-through features.
       sin_p   : +sin on features [d/2, d), 0 elsewhere.
       Both tiled k times along the lane axis (k folded heads)."""
    cos_c, sin_c = rope_cache(S, d, base)
    d2 = d // 2
    pad1 = np.ones((S, D - d), np.float32)
    pad0 = np.zeros((S, D - d), np.float32)
    z_d2 = np.zeros((S, d2), np.float32)
    cos_full = np.concatenate([cos_c, pad1], axis=1)                # [S, D]
    sin_p = np.concatenate([z_d2, sin_c[:, d2:], pad0], axis=1)     # [S, D]
    if k > 1:
        cos_full = np.tile(cos_full, (1, k))
        sin_p = np.tile(sin_p, (1, k))
    L = cos_full.shape[1]
    return cos_full.reshape(S, 1, L), sin_p.reshape(S, 1, L)


def _build_tables_fast(S, d, base):
    """Fast path (d == D, no fold): sign-folded sin table
       sin_signed = concat(-sin_lo, +sin_hi)."""
    cos_c, sin_c = rope_cache(S, d, base)
    d2 = d // 2
    sin_signed = np.concatenate([-sin_c[:, :d2], sin_c[:, d2:]], axis=1)
    return cos_c.reshape(S, 1, d), sin_signed.reshape(S, 1, d)


_TABLE_CACHE = {}


def _tables(S, d, D, k, base, fast):
    key = (S, d, D, k, base, fast)
    t = _TABLE_CACHE.get(key)
    if t is None:
        t = (_build_tables_fast(S, d, base) if fast
             else _build_tables_general(S, d, D, k, base))
        _TABLE_CACHE[key] = t
    return t


# --------------------------------------------------------------------------- #
# Kernel                                                                      #
# --------------------------------------------------------------------------- #

def _rope_kernel(cos_ref, sin_ref, x_ref, o_ref, *, d2, L, fast):
    """Fused elementwise RoPE on one seq-tile.

    cos/sin refs : [tS, 1, L]  (broadcast over rows / sublanes)
    x_ref/o_ref  : [tS, R, L]
    """
    x = x_ref[...]
    if fast:
        # d == D, no fold: one roll, sign-folded sin table.
        x_r = pltpu.roll(x, shift=d2, axis=2)              # lane j <- x[j - d/2]
        out = x * cos_ref[...] + x_r * sin_ref[...]
    else:
        shift_m = (L - d2) % L
        sin_p = sin_ref[...]
        # |sin| on the low half, derived in-kernel (XLU, small slab) instead of
        # streaming a 3rd table from HBM.
        sin_m = pltpu.roll(sin_p, shift=shift_m, axis=2)
        x_p = pltpu.roll(x, shift=d2, axis=2)               # lane j <- x[j - d/2]
        x_m = pltpu.roll(x, shift=shift_m, axis=2)           # lane j <- x[j + d/2]
        out = x * cos_ref[...] + x_p * sin_p - x_m * sin_m
    o_ref[...] = out.astype(o_ref.dtype)


# --------------------------------------------------------------------------- #
# Wrapper                                                                     #
# --------------------------------------------------------------------------- #

def _choose_fold(H, D):
    """Smallest divisor k of H such that k*D is lane-dense (multiple of 128).
    Falls back to full fold (widest lanes) if no divisor achieves density."""
    for k in range(1, H + 1):
        if H % k == 0 and (k * D) % 128 == 0:
            return k
    return H


def _vmem_capacity_bytes():
    try:
        info = pltpu.get_tpu_info()
        cap = getattr(info, "vmem_capacity_bytes", None)
        if cap:
            return int(cap)
    except Exception:
        pass
    return 128 << 20   # v5e / v6e default


def rope_forward(x, embedding_dim, base=10000, *,
                 seq_tile=None, vmem_limit_bytes=None, in_place=False):
    """x: [S, B, H, D] (f32 or bf16) -> [S, B, H, D]; RoPE on the first
    `embedding_dim` features of the last dim, remaining features pass through."""
    S, B, H, D = x.shape
    d = embedding_dim
    assert d % 2 == 0 and 2 <= d <= D
    d2 = d // 2

    # ---- layout: partial head fold for lane density -------------------------
    k = _choose_fold(H, D)
    L = k * D
    R = (B * H) // k
    x3 = x.reshape(S, R, L)              # pure view: folded heads are contiguous

    fast = (k == 1 and d == D)           # single-roll / sign-folded-sin path
    cos_t, sin_t = _tables(S, d, D, k, base, fast)

    # ---- per-generation VMEM budget, with sublane/lane padding accounted ----
    itemsize = jnp.dtype(x.dtype).itemsize
    sub = {4: 8, 2: 16, 1: 32}.get(itemsize, 8)
    R_pad = -(-R // sub) * sub
    L_pad = -(-L // 128) * 128
    # Per seq row, double-buffered: x-in + out blocks, plus 2 f32 table blocks
    # whose size-1 sublane dim pads to 8 rows in VMEM.
    xo_row = 2 * 2 * R_pad * L_pad * itemsize
    tbl_row = 2 * 2 * 8 * L_pad * 4
    per_row = xo_row + tbl_row

    cap = _vmem_capacity_bytes()
    if vmem_limit_bytes is None:
        vmem_limit_bytes = (64 << 20) if cap >= (128 << 20) else (32 << 20)
    block_cap = (48 << 20) if cap >= (128 << 20) else (16 << 20)
    budget = max(per_row, min(vmem_limit_bytes - (8 << 20), block_cap))

    if seq_tile is None:
        tS = max(1, budget // per_row)
        # keep >= ~8 grid steps (megacore on v7x + DMA/compute pipelining),
        # but never shrink tiles below 8 seq rows just to manufacture steps.
        min_steps = 8
        steps_cap = max(min(8, S), (S + min_steps - 1) // min_steps)
        tS = min(tS, steps_cap, S)
        if tS >= 8:
            tS = (tS // 8) * 8
        tS = max(tS, 1)
    else:
        tS = max(1, min(seq_tile, S))

    grid = (pl.cdiv(S, tS),)

    kernel = functools.partial(_rope_kernel, d2=d2, L=L, fast=fast)

    # Only alias x->out when the caller actually donates x into the enclosing
    # jit; otherwise XLA would insert a defensive full copy.
    aliases = {2: 0} if in_place else {}

    out = pl.pallas_call(
        kernel,
        out_shape=jax.ShapeDtypeStruct((S, R, L), x.dtype),
        grid_spec=pltpu.PrefetchScalarGridSpec(
            num_scalar_prefetch=0,
            grid=grid,
            in_specs=[
                pl.BlockSpec((tS, 1, L), lambda i: (i, 0, 0)),   # cos
                pl.BlockSpec((tS, 1, L), lambda i: (i, 0, 0)),   # sin (hi / signed)
                pl.BlockSpec((tS, R, L), lambda i: (i, 0, 0)),   # x
            ],
            out_specs=pl.BlockSpec((tS, R, L), lambda i: (i, 0, 0)),
        ),
        compiler_params=pltpu.CompilerParams(
            dimension_semantics=("parallel",),
            vmem_limit_bytes=vmem_limit_bytes,
        ),
        input_output_aliases=aliases,
    )(cos_t, sin_t, x3)

    return out.reshape(S, B, H, D)


# --------------------------------------------------------------------------- #
# Pure-JAX reference (mirrors the PyTorch forward)                            #
# --------------------------------------------------------------------------- #

def rope_ref(x, embedding_dim, base=10000):
    d = embedding_dim
    S = x.shape[0]
    cos, sin = rope_cache(S, d, base)
    cos = jnp.asarray(cos)[:, None, None, :]
    sin = jnp.asarray(sin)[:, None, None, :]
    x_rope, x_pass = x[..., :d], x[..., d:]
    d2 = d // 2
    neg_half = jnp.concatenate([-x_rope[..., d2:], x_rope[..., :d2]], axis=-1)
    x_rope = x_rope * cos + neg_half * sin
    return jnp.concatenate([x_rope, x_pass], axis=-1)


# --------------------------------------------------------------------------- #
# Self-test                                                                   #
# --------------------------------------------------------------------------- #

if __name__ == "__main__":
    key = jax.random.PRNGKey(0)

    # Case 1: general path — D=32 < 128 exercises the partial head fold
    # (k=4 -> lane dim 128) and embedding_dim=16 < D exercises pass-through.
    S, B, H, D = 8, 2, 4, 32
    embedding_dim = 16
    x = jax.random.normal(key, (S, B, H, D), dtype=jnp.float32)
    rope_jit = jax.jit(functools.partial(rope_forward, embedding_dim=embedding_dim))
    out = jax.block_until_ready(rope_jit(x))
    ref = rope_ref(x, embedding_dim)
    assert out.shape == x.shape and out.dtype == x.dtype
    assert jnp.allclose(out, ref, atol=1e-5, rtol=1e-5), "general path mismatch"

    # Case 2: fast path — embedding_dim == D == 128, no fold, single roll.
    S2, B2, H2, D2 = 8, 2, 2, 128
    x2 = jax.random.normal(jax.random.PRNGKey(1), (S2, B2, H2, D2), dtype=jnp.float32)
    rope_jit2 = jax.jit(functools.partial(rope_forward, embedding_dim=D2))
    out2 = jax.block_until_ready(rope_jit2(x2))
    ref2 = rope_ref(x2, D2)
    assert out2.shape == x2.shape and out2.dtype == x2.dtype
    assert jnp.allclose(out2, ref2, atol=1e-5, rtol=1e-5), "fast path mismatch"

    print("KERNEL_OK")
</pallas_src>

<mosaic_0001>
module attributes {stable_mosaic.version = 11 : i64} {
  func.func @_rope_kernel(%arg0: i32, %arg1: memref<8x1x128xf32, #tpu.memory_space<vmem>>, %arg2: memref<8x1x128xf32, #tpu.memory_space<vmem>>, %arg3: memref<8x2x128xf32, #tpu.memory_space<vmem>>, %arg4: memref<8x2x128xf32, #tpu.memory_space<vmem>>) attributes {dimension_semantics = [#tpu.dimension_semantics<parallel>], iteration_bounds = array<i64: 1>, scalar_prefetch = 0 : i64, scratch_operands = 0 : i64, tpu.core_type = #tpu.core_type<tc>, window_params = [{transform_indices = @transform_0, window_bounds = array<i64: 8, 1, 128>}, {transform_indices = @transform_1, window_bounds = array<i64: 8, 1, 128>}, {transform_indices = @transform_2, window_bounds = array<i64: 8, 2, 128>}, {transform_indices = @transform_3, window_bounds = array<i64: 8, 2, 128>}]} {
    %c0 = arith.constant 0 : index
    %c0_0 = arith.constant 0 : index
    %c0_1 = arith.constant 0 : index
    %0 = vector.load %arg3[%c0, %c0_0, %c0_1] : memref<8x2x128xf32, #tpu.memory_space<vmem>>, vector<8x2x128xf32>
    %c0_2 = arith.constant 0 : index
    %c0_3 = arith.constant 0 : index
    %c0_4 = arith.constant 0 : index
    %1 = vector.load %arg2[%c0_2, %c0_3, %c0_4] : memref<8x1x128xf32, #tpu.memory_space<vmem>>, vector<8x1x128xf32>
    %c120_i32 = arith.constant 120 : i32
    %2 = tpu.dynamic_rotate %1 by %c120_i32 dim 2 : vector<8x1x128xf32>, i32 -> vector<8x1x128xf32>
    %c8_i32 = arith.constant 8 : i32
    %3 = tpu.dynamic_rotate %0 by %c8_i32 dim 2 : vector<8x2x128xf32>, i32 -> vector<8x2x128xf32>
    %c120_i32_5 = arith.constant 120 : i32
    %4 = tpu.dynamic_rotate %0 by %c120_i32_5 dim 2 : vector<8x2x128xf32>, i32 -> vector<8x2x128xf32>
    %c0_6 = arith.constant 0 : index
    %c0_7 = arith.constant 0 : index
    %c0_8 = arith.constant 0 : index
    %5 = vector.load %arg1[%c0_6, %c0_7, %c0_8] : memref<8x1x128xf32, #tpu.memory_space<vmem>>, vector<8x1x128xf32>
    %6 = vector.broadcast %5 : vector<8x1x128xf32> to vector<8x2x128xf32>
    %7 = arith.mulf %0, %6 : vector<8x2x128xf32>
    %8 = vector.broadcast %1 : vector<8x1x128xf32> to vector<8x2x128xf32>
    %9 = arith.mulf %3, %8 : vector<8x2x128xf32>
    %10 = arith.addf %7, %9 : vector<8x2x128xf32>
    %11 = vector.broadcast %2 : vector<8x1x128xf32> to vector<8x2x128xf32>
    %12 = arith.mulf %4, %11 : vector<8x2x128xf32>
    %13 = arith.subf %10, %12 : vector<8x2x128xf32>
    %c0_9 = arith.constant 0 : index
    %c0_10 = arith.constant 0 : index
    %c0_11 = arith.constant 0 : index
    %14 = vector.load %arg4[%c0_9, %c0_10, %c0_11] : memref<8x2x128xf32, #tpu.memory_space<vmem>>, vector<8x2x128xf32>
    tpu.vector_store %arg4[%c0_9, %c0_10, %c0_11], %13 {strides = array<i32>} : memref<8x2x128xf32, #tpu.memory_space<vmem>>, vector<8x2x128xf32>,
    return
  }
  func.func @transform_0(%arg0: i32) -> (i32, i32, i32) {
    %c0_i32 = arith.constant 0 : i32
    %c0_i32_0 = arith.constant 0 : i32
    %c0_i32_1 = arith.constant 0 : i32
    return %arg0, %c0_i32, %c0_i32_0 : i32, i32, i32
  }
  func.func @transform_1(%arg0: i32) -> (i32, i32, i32) {
    %c0_i32 = arith.constant 0 : i32
    %c0_i32_0 = arith.constant 0 : i32
    %c0_i32_1 = arith.constant 0 : i32
    return %arg0, %c0_i32, %c0_i32_0 : i32, i32, i32
  }
  func.func @transform_2(%arg0: i32) -> (i32, i32, i32) {
    %c0_i32 = arith.constant 0 : i32
    %c0_i32_0 = arith.constant 0 : i32
    %c0_i32_1 = arith.constant 0 : i32
    return %arg0, %c0_i32, %c0_i32_0 : i32, i32, i32
  }
  func.func @transform_3(%arg0: i32) -> (i32, i32, i32) {
    %c0_i32 = arith.constant 0 : i32
    %c0_i32_0 = arith.constant 0 : i32
    %c0_i32_1 = arith.constant 0 : i32
    return %arg0, %c0_i32, %c0_i32_0 : i32, i32, i32
  }
}

</mosaic_0001>

<bundles_post_ra>
// kernel: rope_forward.1
= control target key start
LH: loop header
LB: loop body
LE: loop exit
PB: predicated region body
PF: predicated region fallthrough
CT: control target
= control target key end

     0   :  { %8 = vsyncpa [#allocation3], 0  ;;  %s608_s0 = inlined_call_operand.hbm [shape: f32[8,1,128], index: 0, kind: input, shape index: {}]   ;;  %s609_s1 = inlined_call_operand.hbm [shape: f32[8,1,128], index: 1, kind: input, shape index: {}]   ;;  %s610_s2 = inlined_call_operand.hbm [shape: f32[8,2,128], index: 2, kind: input, shape index: {}]   ;;  %s611_s3 = inlined_call_operand.hbm [shape: f32[8,2,128], index: 3, kind: output, shape index: {}]  }
   0x1   :  { %9 = vsyncpa [#allocation6], 0 }
   0x2   :  { %10 = vsyncpa [#allocation4], 0  ;;  %s434_s12 = smov [#allocation5]   ;;  %s435_s14 = smov [#allocation2]  }
   0x3   :  { %s28_s13 = sshll.u32 %s434_s12, 4  ;;  %s16_s15 = sshll.u32 %s435_s14, 4  ;;  %s29_s13 = int_to_ptr.vmem [resolvable:$true] %s28_s13  ;;  %s464_s15 = int_to_ptr.vmem [resolvable:$true] %s16_s15 }
   0x4   :  { %s340_s18 = scalar_lea.hbm %s609_s1, 128 }
   0x5   :  { %p341_p0 = scmp.ne.s32.totalorder %s609_s1, %s340_s18  ;;  %p344_p1 = scmp.lt.u32.totalorder %s340_s18, %s609_s1 }
   0x7   :  { %p346_p2 = pnand %p344_p1, %p341_p0 }
   0x9   :  { %349 = shalt.err (!%p346_p2)
}
   0xa   :  { %s350_s23 = scalar_lea.vmem %s29_s13, 128  ;;  %p355_p4 = scmp.lt.s32.totalorder %s29_s13, %s29_s13 }
   0xb   :  { %p351_p3 = scmp.ne.s32.totalorder %s29_s13, %s350_s23  ;;  %p356_p5 = scmp.lt.s32.totalorder %s350_s23, %s350_s23 }
   0xd   :  { %p357_p6 = por %p356_p5, %p355_p4 }
   0xf   :  { %p358_p7 = pnand %p357_p6, %p351_p3 }
  0x11   :  { %361 = shalt.err (!%p358_p7)
}
  0x12   :  { %s436_s24 = smov 16   ;;  %s437_s25 = smov 1  }
  0x13   :  { %34 = dma.hbm_to_vmem [thread:$0]  %s609_s1, 128, %s29_s13, [#allocation6], %s436_s24, %s436_s24, %s437_s25  }
  0x14   :  { %s362_s30 = scalar_lea.hbm %s608_s0, 128 }
  0x15   :  { %p363_p8 = scmp.ne.s32.totalorder %s608_s0, %s362_s30  ;;  %p366_p9 = scmp.lt.u32.totalorder %s362_s30, %s608_s0 }
  0x17   :  { %p368_p10 = pnand %p366_p9, %p363_p8 }
  0x19   :  { %371 = shalt.err (!%p368_p10)
}
  0x1a   :  { %s372_s8 = scalar_lea.vmem %s464_s15, 128  ;;  %p377_p12 = scmp.lt.s32.totalorder %s464_s15, %s464_s15 }
  0x1b   :  { %p373_p11 = scmp.ne.s32.totalorder %s464_s15, %s372_s8  ;;  %p378_p13 = scmp.lt.s32.totalorder %s372_s8, %s372_s8 }
  0x1d   :  { %p379_p0 = por %p378_p13, %p377_p12 }
  0x1f   :  { %p380_p1 = pnand %p379_p0, %p373_p11 }
  0x21   :  { %383 = shalt.err (!%p380_p1)
}
  0x22   :  { %22 = dma.hbm_to_vmem [thread:$0]  %s608_s0, 128, %s464_s15, [#allocation3], %s436_s24, %s436_s24, %s437_s25  }
  0x23   :  { %s438_s10 = smov [#allocation7]   ;;  %s384_s14 = scalar_lea.hbm %s610_s2, 256 }
  0x24   :  { %s40_s11 = sshll.u32 %s438_s10, 4  ;;  %p385_p2 = scmp.ne.s32.totalorder %s610_s2, %s384_s14  ;;  %s41_s11 = int_to_ptr.vmem [resolvable:$true] %s40_s11 }
  0x25   :  { %p388_p3 = scmp.lt.u32.totalorder %s384_s14, %s610_s2 }
  0x27   :  { %p390_p4 = pnand %p388_p3, %p385_p2 }
  0x29   :  { %393 = shalt.err (!%p390_p4)
}
  0x2a   :  { %s394_s20 = scalar_lea.vmem %s41_s11, 256  ;;  %p399_p6 = scmp.lt.s32.totalorder %s41_s11, %s41_s11 }
  0x2b   :  { %p395_p5 = scmp.ne.s32.totalorder %s41_s11, %s394_s20  ;;  %p400_p7 = scmp.lt.s32.totalorder %s394_s20, %s394_s20 }
  0x2d   :  { %p401_p8 = por %p400_p7, %p399_p6 }
  0x2f   :  { %p402_p9 = pnand %p401_p8, %p395_p5 }
  0x31   :  { %405 = shalt.err (!%p402_p9)
}
  0x32   :  { %s439_s0 = smov 32   ;;  %s440_s15 = smov 2  }
  0x33   :  { %46 = dma.hbm_to_vmem [thread:$0]  %s610_s2, 256, %s41_s11, [#allocation6], %s439_s0, %s439_s0, %s440_s15  }
  0x34   :  { %428 = dma.done.wait [#allocation3], 128  }
  0x35   :  { %429 = vsyncadd [#allocation3], 4294967168 }
  0x36   :  { %430 = dma.done.wait [#allocation6], 384  }
  0x37   :  { %431 = vsyncadd [#allocation6], 4294966912  ;;  %v510_v0 = vld [vmem:[#allocation5 + $0x2] sm:$0x1]  ;;  %v512_v1 = vld [vmem:[#allocation5] sm:$0x1]  ;;  %v192_v18 = vlaneseq }
  0x38   :  { %s441_s23 = smov 120   ;;  %v518_v2 = vld [vmem:[#allocation5 + $0x3] sm:$0x1]  ;;  %v65_v3 = vld [vmem:[#allocation5 + $0x1] sm:$0x1]  ;;  %s442_s2 = smov 8  }
  0x39   :  { %76 = vrot.lane.b32.xlu1 %v510_v0, %s441_s23  ;;  %72 = vrot.lane.b32.xlu0 %v512_v1, %s441_s23  ;;  %v523_v4 = vld [vmem:[#allocation5 + $0x5] sm:$0x1]  ;;  %v525_v5 = vld [vmem:[#allocation5 + $0x4] sm:$0x1]  ;;  %v531_v6 = vld [vmem:[#allocation5 + $0x7] sm:$0x1] }
  0x3a   :  { %v533_v7 = vld [vmem:[#allocation5 + $0x6] sm:$0x1]  ;;  %v57_v8 = vld [vmem:[#allocation7 + $0x2] sm:$0x3]  ;;  %v56_v9 = vld [vmem:[#allocation7] sm:$0x3] }
  0x3b   :  { %v59_v10 = vld [vmem:[#allocation7 + $0x6] sm:$0x3]  ;;  %v58_v11 = vld [vmem:[#allocation7 + $0x4] sm:$0x3]  ;;  %v61_v12 = vld [vmem:[#allocation7 + $0xa] sm:$0x3] }
  0x3c   :  { %v60_v13 = vld [vmem:[#allocation7 + $0x8] sm:$0x3]  ;;  %v63_v14 = vld [vmem:[#allocation7 + $0xe] sm:$0x3]  ;;  %v62_v15 = vld [vmem:[#allocation7 + $0xc] sm:$0x3] }
  0x3d   :  { %78 = vrot.lane.b32.xlu1 %v518_v2, %s441_s23  ;;  %74 = vrot.lane.b32.xlu0 %v65_v3, %s441_s23  ;;  %v193_v21 = vshrl.u32 %v192_v18, 7  ;;  %v323_v25 = vld [vmem:[#allocation2 + $0x1] ss:$0 sm:$0xff]  ;;  %v322_v26 = vld [vmem:[#allocation2] ss:$0 sm:$0xff]  ;;  %s443_s24 = smov [#allocation8]  }
  0x3e   :  { %v177_v31 = vmul.f32 %v323_v25, %v57_v8  ;;  %v176_v32 = vmul.f32 %v322_v26, %v56_v9  ;;  %v325_v33 = vld [vmem:[#allocation2 + $0x3] ss:$0 sm:$0xff]  ;;  %v324_v34 = vld [vmem:[#allocation2 + $0x2] ss:$0 sm:$0xff]  ;;  %v327_v45 = vld [vmem:[#allocation2 + $0x5] ss:$0 sm:$0xff] }
  0x3f   :  { %v557_v24 = vsub.s32 0, %v193_v21  ;;  %v179_v41 = vmul.f32 %v325_v33, %v59_v10  ;;  %v178_v42 = vmul.f32 %v324_v34, %v58_v11  ;;  %v326_v46 = vld [vmem:[#allocation2 + $0x4] ss:$0 sm:$0xff]  ;;  %v181_v53 = vmul.f32 %v327_v45, %v61_v12  ;;  %v329_v57 = vld [vmem:[#allocation2 + $0x7] ss:$0 sm:$0xff]  ;;  %s309_s25 = sshll.u32 %s443_s24, 4  ;;  %s310_s25 = int_to_ptr.vmem [resolvable:$true] %s309_s25 }
  0x40   :  { %v180_v54 = vmul.f32 %v326_v46, %v60_v13  ;;  %v328_v58 = vld [vmem:[#allocation2 + $0x6] ss:$0 sm:$0xff]  ;;  %s406_s26 = scalar_lea.vmem %s310_s25, 256  ;;  %p411_p11 = scmp.lt.s32.totalorder %s310_s25, %s310_s25 }
  0x41   :  { %82 = vrot.lane.b32.xlu1 %v523_v4, %s441_s23  ;;  %80 = vrot.lane.b32.xlu0 %v525_v5, %s441_s23  ;;  %v195_v29 = vrot.slane %v512_v1, %v557_v24  ;;  %v199_v30 = vrot.slane %v65_v3, %v557_v24  ;;  %v203_v37 = vrot.slane %v510_v0, %v557_v24  ;;  %p407_p10 = scmp.ne.s32.totalorder %s310_s25, %s406_s26  ;;  %p412_p12 = scmp.lt.s32.totalorder %s406_s26, %s406_s26 }
  0x42   :  { %v207_v40 = vrot.slane %v518_v2, %v557_v24  ;;  %v215_v51 = vrot.slane %v523_v4, %v557_v24  ;;  %v211_v52 = vrot.slane %v525_v5, %v557_v24  ;;  %v223_v63 = vrot.slane %v531_v6, %v557_v24 }
  0x43   :  { %v219_v0 = vrot.slane %v533_v7, %v557_v24  ;;  %v183_v1 = vmul.f32 %v329_v57, %v63_v14  ;;  %v182_v2 = vmul.f32 %v328_v58, %v62_v15  ;;  %p413_p13 = por %p412_p12, %p411_p11 }
  0x45   :  { %86 = vrot.lane.b32.xlu1 %v531_v6, %s441_s23  ;;  %84 = vrot.lane.b32.xlu0 %v533_v7, %s441_s23  ;;  %p414_p0 = pnand %p413_p13, %p407_p10 }
  0x49   :  { %90 = vrot.lane.b32.xlu1 %v57_v8, %s442_s2  ;;  %88 = vrot.lane.b32.xlu0 %v56_v9, %s442_s2 }
  0x4d   :  { %94 = vrot.lane.b32.xlu1 %v59_v10, %s442_s2  ;;  %92 = vrot.lane.b32.xlu0 %v58_v11, %s442_s2 }
  0x51   :  { %98 = vrot.lane.b32.xlu1 %v61_v12, %s442_s2  ;;  %96 = vrot.lane.b32.xlu0 %v60_v13, %s442_s2 }
  0x55   :  { %102 = vrot.lane.b32.xlu1 %v63_v14, %s442_s2  ;;  %100 = vrot.lane.b32.xlu0 %v62_v15, %s442_s2 }
  0x59   :  { %106 = vrot.lane.b32.xlu1 %v57_v8, %s441_s23  ;;  %104 = vrot.lane.b32.xlu0 %v56_v9, %s441_s23 }
  0x5d   :  { %110 = vrot.lane.b32.xlu1 %v59_v10, %s441_s23  ;;  %108 = vrot.lane.b32.xlu0 %v58_v11, %s441_s23 }
  0x61   :  { %114 = vrot.lane.b32.xlu1 %v61_v12, %s441_s23  ;;  %112 = vrot.lane.b32.xlu0 %v60_v13, %s441_s23 }
  0x65   :  { %118 = vrot.lane.b32.xlu1 %v63_v14, %s441_s23  ;;  %116 = vrot.lane.b32.xlu0 %v62_v15, %s441_s23 }
  0xab   :  { %v547_v16 = vpop.permute.xlu1 %76  ;;  %v549_v17 = vpop.permute.xlu0 %72 }
  0xac   :  { %v251_v11 = vrot.slane %v549_v17, %v557_v24  ;;  %v259_v7 = vrot.slane %v547_v16, %v557_v24 }
  0xaf   :  { %v551_v19 = vpop.permute.xlu1 %78  ;;  %v75_v20 = vpop.permute.xlu0 %74 }
  0xb0   :  { %v255_v12 = vrot.slane %v75_v20, %v557_v24  ;;  %v263_v14 = vrot.slane %v551_v19, %v557_v24 }
  0xb3   :  { %v553_v22 = vpop.permute.xlu1 %82  ;;  %v555_v23 = vpop.permute.xlu0 %80 }
  0xb4   :  { %v267_v33 = vrot.slane %v555_v23, %v557_v24 }
  0xb7   :  { %v559_v27 = vpop.permute.xlu1 %86  ;;  %v561_v28 = vpop.permute.xlu0 %84 }
  0xbb   :  { %v91_v35 = vpop.permute.xlu1 %90  ;;  %v89_v36 = vpop.permute.xlu0 %88 }
  0xbc   :  { %v233_v38 = vmul.f32 %v199_v30, %v91_v35  ;;  %v232_v39 = vmul.f32 %v195_v29, %v89_v36 }
  0xbe   :  { %v241_v43 = vadd.f32 %v233_v38, %v177_v31  ;;  %v240_v44 = vadd.f32 %v232_v39, %v176_v32  ;;  %v271_v32 = vrot.slane %v553_v22, %v557_v24  ;;  %v279_v38 = vrot.slane %v559_v27, %v557_v24 }
  0xbf   :  { %v95_v47 = vpop.permute.xlu1 %94  ;;  %v93_v48 = vpop.permute.xlu0 %92  ;;  %v275_v39 = vrot.slane %v561_v28, %v557_v24 }
  0xc0   :  { %v235_v49 = vmul.f32 %v207_v40, %v95_v47  ;;  %v234_v50 = vmul.f32 %v203_v37, %v93_v48 }
  0xc2   :  { %v243_v55 = vadd.f32 %v235_v49, %v179_v41  ;;  %v242_v56 = vadd.f32 %v234_v50, %v178_v42 }
  0xc3   :  { %v99_v59 = vpop.permute.xlu1 %98  ;;  %v97_v60 = vpop.permute.xlu0 %96 }
  0xc4   :  { %v237_v61 = vmul.f32 %v215_v51, %v99_v59  ;;  %v236_v62 = vmul.f32 %v211_v52, %v97_v60 }
  0xc6   :  { %v245_v3 = vadd.f32 %v237_v61, %v181_v53  ;;  %v244_v4 = vadd.f32 %v236_v62, %v180_v54 }
  0xc7   :  { %v103_v5 = vpop.permute.xlu1 %102  ;;  %v101_v8 = vpop.permute.xlu0 %100 }
  0xc8   :  { %v239_v9 = vmul.f32 %v223_v63, %v103_v5  ;;  %v238_v10 = vmul.f32 %v219_v0, %v101_v8 }
  0xca   :  { %v247_v13 = vadd.f32 %v239_v9, %v183_v1  ;;  %v246_v18 = vadd.f32 %v238_v10, %v182_v2 }
  0xcb   :  { %v107_v21 = vpop.permute.xlu1 %106  ;;  %v105_v6 = vpop.permute.xlu0 %104 }
  0xcc   :  { %v281_v25 = vmul.f32 %v255_v12, %v107_v21  ;;  %v280_v26 = vmul.f32 %v251_v11, %v105_v6 }
  0xce   :  { %v289_v15 = vsub.f32 %v241_v43, %v281_v25  ;;  %v288_v29 = vsub.f32 %v240_v44, %v280_v26 }
  0xcf   :  { %v111_v30 = vpop.permute.xlu1 %110  ;;  %v109_v31 = vpop.permute.xlu0 %108 }
  0xd0   :  { %297 = vst [vmem:[#allocation8 + $0x2] sm:$0x3] %v289_v15  ;;  %296 = vst [vmem:[#allocation8] sm:$0x3] %v288_v29  ;;  %v283_v17 = vmul.f32 %v263_v14, %v111_v30  ;;  %v282_v20 = vmul.f32 %v259_v7, %v109_v31 }
  0xd2   :  { %v291_v34 = vsub.f32 %v243_v55, %v283_v17  ;;  %v290_v35 = vsub.f32 %v242_v56, %v282_v20 }
  0xd3   :  { %v115_v16 = vpop.permute.xlu1 %114  ;;  %v113_v36 = vpop.permute.xlu0 %112 }
  0xd4   :  { %299 = vst [vmem:[#allocation8 + $0x6] sm:$0x3] %v291_v34  ;;  %298 = vst [vmem:[#allocation8 + $0x4] sm:$0x3] %v290_v35  ;;  %v285_v19 = vmul.f32 %v271_v32, %v115_v16  ;;  %v284_v37 = vmul.f32 %v267_v33, %v113_v36 }
  0xd6   :  { %v293_v40 = vsub.f32 %v245_v3, %v285_v19  ;;  %v292_v41 = vsub.f32 %v244_v4, %v284_v37 }
  0xd7   :  { %v119_v22 = vpop.permute.xlu1 %118  ;;  %v117_v42 = vpop.permute.xlu0 %116 }
  0xd8   :  { %301 = vst [vmem:[#allocation8 + $0xa] sm:$0x3] %v293_v40  ;;  %300 = vst [vmem:[#allocation8 + $0x8] sm:$0x3] %v292_v41  ;;  %v287_v23 = vmul.f32 %v279_v38, %v119_v22  ;;  %v286_v43 = vmul.f32 %v275_v39, %v117_v42 }
  0xda   :  { %v295_v44 = vsub.f32 %v247_v13, %v287_v23  ;;  %v294_v45 = vsub.f32 %v246_v18, %v286_v43 }
  0xdc   :  { %303 = vst [vmem:[#allocation8 + $0xe] sm:$0x3] %v295_v44  ;;  %302 = vst [vmem:[#allocation8 + $0xc] sm:$0x3] %v294_v45 }
  0xdd   :  { %417 = shalt.err (!%p414_p0)
}
  0xde   :  { %s418_s29 = scalar_lea.hbm %s611_s3, 256 }
  0xdf   :  { %p419_p1 = scmp.ne.s32.totalorder %s611_s3, %s418_s29  ;;  %p422_p2 = scmp.lt.u32.totalorder %s418_s29, %s611_s3 }
  0xe1   :  { %p424_p3 = pnand %p422_p2, %p419_p1 }
  0xe3   :  { %427 = shalt.err (!%p424_p3)
}
  0xe4   :  { %315 = dma.vmem_to_hbm [thread:$0]  %s310_s25, 256, %s611_s3, [#allocation4], %s439_s0, %s439_s0, %s440_s15  }
  0xe5   :  { %432 = dma.done.wait [#allocation4], 256  }
  0xe6   :  { %433 = vsyncadd [#allocation4], 4294967040 }
  0xe7   :  { %319 = vsyncpa [#allocation3], 1 }
  0xe8   :  { %320 = vsyncpa [#allocation6], 1 }
  0xe9   :  { %321 = vsyncpa [#allocation4], 1 }

</bundles_post_ra>
